<compile_context>
chip_gen: v5e
topology: v5e:2x2
jax: 0.10.0
libtpu: 0.0.40
codegen_flags: <defaults>
</compile_context>

<pallas_src>
import dataclasses
from typing import Sequence, Tuple

import jax
import jax.numpy as jnp
from jax.experimental import pallas as pl
from jax.experimental.pallas import tpu as pltpu


# ----------------------------------------------------------------------------
# Lightweight stand-in for the pdsketch `Value` container.
# ----------------------------------------------------------------------------
@dataclasses.dataclass
class Value:
    tensor: jnp.ndarray
    batch_dims: int
    batch_variables: Tuple[str, ...]


_SMALL_N_THRESHOLD = 128   # below one lane-dense tile: plain XLA is faster
_TILE_N_DEFAULT = 1024     # rows per grid step (multiple of 128)


def _round_up(x: int, m: int) -> int:
    return ((x + m - 1) // m) * m


# ----------------------------------------------------------------------------
# Pallas kernel: one N-tile of   relu(w1.T @ x + b1) -> sum_h(h * w2) + b2
#   xt_ref : [F_total, TILE_N]   (feature on sublanes, batch on lanes)
#   w1t_ref: [H, F_total]        (resident across the grid)
#   b1_ref : [H, 1]   f32
#   w2_ref : [H, 1]   f32
#   b2_ref : [1, 1]   f32
#   o_ref  : [1, TILE_N]  f32    (lane-dense output slab)
# ----------------------------------------------------------------------------
def _mlp_kernel_t(xt_ref, w1t_ref, b1_ref, w2_ref, b2_ref, o_ref):
    # First linear layer on the MXU, accumulate in f32.
    h = jnp.dot(w1t_ref[...], xt_ref[...], preferred_element_type=jnp.float32)
    # Bias + ReLU on the VPU in f32 (v5e-safe even when inputs are bf16).
    h = jnp.maximum(h + b1_ref[...], 0.0)                       # [H, TILE_N]
    # Second "linear" layer (output width 1): VPU multiply + sublane reduce
    # (XLU) instead of a degenerate MXU matmul.
    o = jnp.sum(h * w2_ref[...], axis=0, keepdims=True) + b2_ref[...]
    o_ref[...] = o.astype(o_ref.dtype)                          # [1, TILE_N]


def _run_wrapped_mlp(x: jnp.ndarray, params, *, use_bf16: bool = False,
                     tile_n: int = None) -> jnp.ndarray:
    """x: [N, F_total]  ->  [N, 1] (f32). Implements Linear->ReLU->Linear(.,1)."""
    w1, b1, w2, b2 = params
    n, f_total = x.shape
    hidden = w1.shape[1]
    out_dim = w2.shape[1]
    assert w1.shape == (f_total, hidden)
    assert out_dim == 1, "This instantiation wraps a scalar-output head."

    if n < _SMALL_N_THRESHOLD:
        # Tiny-batch path: a pallas_call costs more than the work itself.
        h = jnp.maximum(x @ w1 + b1.reshape(1, hidden), 0.0)
        return (h @ w2 + b2.reshape(1, out_dim)).astype(jnp.float32)

    if tile_n is None:
        tile_n = _TILE_N_DEFAULT
    tile_n = min(tile_n, _round_up(n, 128))
    assert tile_n % 128 == 0, "tile_n must be a multiple of 128 (lane width)."
    n_pad = _round_up(n, tile_n)

    # Batch on the lane axis: [F_total, N_pad]. Concat already happened
    # wrapper-side; transpose + pad are cheap XLA ops fused into the feed.
    x_t = x.T
    if n_pad != n:
        x_t = jnp.pad(x_t, ((0, 0), (0, n_pad - n)))

    w1t = w1.T                              # [H, F_total]
    b1c = b1.reshape(hidden, 1).astype(jnp.float32)
    w2c = w2.reshape(hidden, 1).astype(jnp.float32)
    b2c = b2.reshape(1, 1).astype(jnp.float32)

    compute_dtype = jnp.bfloat16 if use_bf16 else x.dtype
    x_t = x_t.astype(compute_dtype)
    w1t = w1t.astype(compute_dtype)

    grid = (n_pad // tile_n,)
    out = pl.pallas_call(
        _mlp_kernel_t,
        out_shape=jax.ShapeDtypeStruct((1, n_pad), jnp.float32),
        grid=grid,
        in_specs=[
            # streamed, double-buffered N tiles
            pl.BlockSpec((f_total, tile_n), lambda i: (0, i)),
            # weights / biases: constant block index -> stay VMEM-resident
            pl.BlockSpec((hidden, f_total), lambda i: (0, 0)),
            pl.BlockSpec((hidden, 1), lambda i: (0, 0)),
            pl.BlockSpec((hidden, 1), lambda i: (0, 0)),
            pl.BlockSpec((1, 1), lambda i: (0, 0)),
        ],
        out_specs=pl.BlockSpec((1, tile_n), lambda i: (0, i)),
        compiler_params=pltpu.CompilerParams(
            dimension_semantics=("parallel",),   # shard tiles across TCs (v7x)
            vmem_limit_bytes=32 * 1024 * 1024,   # safe on v5e/v6e/v7x; tiny working set
        ),
    )(x_t, w1t, b1c, w2c, b2c)

    # Drop padding rows and restore the [N, 1] shape the wrapper expects.
    return out[:, :n].reshape(n, 1)


# ----------------------------------------------------------------------------
# AutoBatchWrapper forward semantics (glue in plain JAX, compute in Pallas).
# ----------------------------------------------------------------------------
def auto_batch_wrapper_forward(values: Sequence[Value], params,
                               concat: bool = True, squeeze: int = -1,
                               use_bf16: bool = False, tile_n: int = None):
    # TODO(synk): only the concat=True + (Linear->ReLU->Linear(.,1)) wrapped
    # module used by the babyai heads is fused; arbitrary wrapped nn.Modules
    # are out of scope for a single kernel.
    assert concat, "Only concat=True path is exercised (matches babyai usage)."
    v = values[0]
    total_batch_dims = v.batch_dims + len(v.batch_variables)

    tensors = tuple(val.tensor for val in values)
    if total_batch_dims == 0:
        tensors = tuple(t[None, ...] for t in tensors)
    else:
        tensors = tuple(t.reshape((-1,) + t.shape[total_batch_dims:]) for t in tensors)

    # torch.cat(tensors, dim=-1) — done wrapper-side (cheap XLA op), so the
    # kernel never does a cross-lane relayout.
    x = tensors[0] if len(tensors) == 1 else jnp.concatenate(tensors, axis=-1)

    rv = _run_wrapped_mlp(x, params, use_bf16=use_bf16, tile_n=tile_n)   # [N, 1]

    if total_batch_dims == 0:
        rv = jnp.squeeze(rv, axis=0)
    else:
        rv = rv.reshape(v.tensor.shape[:total_batch_dims] + rv.shape[1:])

    if squeeze is not None:
        assert squeeze == -1, "Only last-dim squeezing is implemented."
        rv = jnp.squeeze(rv, axis=-1)
    return rv


# ----------------------------------------------------------------------------
# Deterministic parameter init + pure-JAX reference.
# ----------------------------------------------------------------------------
def make_params(key, f1, f2, hidden, out_dim=1):
    in_dim = f1 + f2
    k1, k2, k3, k4 = jax.random.split(key, 4)
    w1 = jax.random.normal(k1, (in_dim, hidden), jnp.float32) * 0.1
    b1 = jax.random.normal(k2, (1, hidden), jnp.float32) * 0.1
    w2 = jax.random.normal(k3, (hidden, out_dim), jnp.float32) * 0.1
    b2 = jax.random.normal(k4, (1, out_dim), jnp.float32) * 0.1
    return (w1, b1, w2, b2)


def reference_forward(values, params, squeeze=-1):
    v = values[0]
    tbd = v.batch_dims + len(v.batch_variables)
    ts = tuple(val.tensor.reshape((-1,) + val.tensor.shape[tbd:]) for val in values)
    x = jnp.concatenate(ts, axis=-1)
    w1, b1, w2, b2 = params
    h = jnp.maximum(x @ w1 + b1, 0.0)
    o = h @ w2 + b2
    o = o.reshape(v.tensor.shape[:tbd] + o.shape[1:])
    if squeeze is not None:
        o = jnp.squeeze(o, axis=-1)
    return o


if __name__ == "__main__":
    key = jax.random.PRNGKey(0)
    kx1, kx2, kp, ky1, ky2 = jax.random.split(key, 5)

    F1, F2, HIDDEN = 4, 4, 32
    params = make_params(kp, F1, F2, HIDDEN)

    # --- Config A: exercises the Pallas kernel with a multi-tile grid -------
    B1, B2 = 4, 128                      # N = 512 rows, tile_n=128 -> grid=(4,)
    x1 = jax.random.normal(kx1, (B1, B2, F1), jnp.float32)
    x2 = jax.random.normal(kx2, (B1, B2, F2), jnp.float32)
    v1 = Value(tensor=x1, batch_dims=1, batch_variables=("o1",))
    v2 = Value(tensor=x2, batch_dims=1, batch_variables=("o1",))

    out = auto_batch_wrapper_forward([v1, v2], params, concat=True, squeeze=-1,
                                     tile_n=128)
    out = jax.block_until_ready(out)
    ref = reference_forward([v1, v2], params, squeeze=-1)
    assert out.shape == (B1, B2), out.shape
    assert jnp.allclose(out, ref, atol=1e-5, rtol=1e-5), "f32 kernel mismatch"

    # bf16 compute path (MXU inputs bf16, f32 accumulate/elementwise).
    out_bf16 = auto_batch_wrapper_forward([v1, v2], params, concat=True,
                                          squeeze=-1, use_bf16=True, tile_n=128)
    out_bf16 = jax.block_until_ready(out_bf16)
    assert jnp.allclose(out_bf16, ref, atol=5e-2, rtol=5e-2), "bf16 kernel mismatch"

    # --- Config B: tiny batch -> small-N fallback path (no kernel launch) ---
    y1 = jax.random.normal(ky1, (2, 8, F1), jnp.float32)
    y2 = jax.random.normal(ky2, (2, 8, F2), jnp.float32)
    u1 = Value(tensor=y1, batch_dims=1, batch_variables=("o1",))
    u2 = Value(tensor=y2, batch_dims=1, batch_variables=("o1",))
    out_small = auto_batch_wrapper_forward([u1, u2], params, concat=True, squeeze=-1)
    out_small = jax.block_until_ready(out_small)
    ref_small = reference_forward([u1, u2], params, squeeze=-1)
    assert out_small.shape == (2, 8), out_small.shape
    assert jnp.allclose(out_small, ref_small, atol=1e-5, rtol=1e-5), "small-N mismatch"

    print("KERNEL_OK")
</pallas_src>

<mosaic_0001>
module attributes {stable_mosaic.version = 11 : i64} {
  func.func @_mlp_kernel_t(%arg0: i32, %arg1: memref<8x128xf32, #tpu.memory_space<vmem>>, %arg2: memref<32x8xf32, #tpu.memory_space<vmem>>, %arg3: memref<32x1xf32, #tpu.memory_space<vmem>>, %arg4: memref<32x1xf32, #tpu.memory_space<vmem>>, %arg5: memref<1x1xf32, #tpu.memory_space<vmem>>, %arg6: memref<1x128xf32, #tpu.memory_space<vmem>>) attributes {dimension_semantics = [#tpu.dimension_semantics<parallel>], iteration_bounds = array<i64: 4>, scalar_prefetch = 0 : i64, scratch_operands = 0 : i64, tpu.core_type = #tpu.core_type<tc>, window_params = [{transform_indices = @transform_0, window_bounds = array<i64: 8, 128>}, {pipeline_mode = #tpu.pipeline_mode<synchronous>, transform_indices = @transform_1, window_bounds = array<i64: 32, 8>}, {pipeline_mode = #tpu.pipeline_mode<synchronous>, transform_indices = @transform_2, window_bounds = array<i64: 32, 1>}, {pipeline_mode = #tpu.pipeline_mode<synchronous>, transform_indices = @transform_3, window_bounds = array<i64: 32, 1>}, {pipeline_mode = #tpu.pipeline_mode<synchronous>, transform_indices = @transform_4, window_bounds = array<i64: 1, 1>}, {transform_indices = @transform_5, window_bounds = array<i64: 1, 128>}]} {
    %c0 = arith.constant 0 : index
    %c0_0 = arith.constant 0 : index
    %0 = vector.load %arg2[%c0, %c0_0] : memref<32x8xf32, #tpu.memory_space<vmem>>, vector<32x8xf32>
    %c0_1 = arith.constant 0 : index
    %c0_2 = arith.constant 0 : index
    %1 = vector.load %arg1[%c0_1, %c0_2] : memref<8x128xf32, #tpu.memory_space<vmem>>, vector<8x128xf32>
    %cst = arith.constant dense<0.000000e+00> : vector<32x128xf32>
    %2 = tpu.matmul %0, %1, %cst {dimension_numbers = #tpu.dot_dimension_numbers<[1], [0], [0], [1], [0, 0, 1, 1], [], []>} : vector<32x8xf32>, vector<8x128xf32>, vector<32x128xf32> -> vector<32x128xf32>
    %c0_3 = arith.constant 0 : index
    %c0_4 = arith.constant 0 : index
    %3 = vector.load %arg3[%c0_3, %c0_4] : memref<32x1xf32, #tpu.memory_space<vmem>>, vector<32x1xf32>
    %4 = vector.broadcast %3 : vector<32x1xf32> to vector<32x128xf32>
    %5 = arith.addf %2, %4 : vector<32x128xf32>
    %cst_5 = arith.constant 0.000000e+00 : f32
    %6 = vector.broadcast %cst_5 : f32 to vector<32x128xf32>
    %7 = arith.maximumf %5, %6 : vector<32x128xf32>
    %c0_6 = arith.constant 0 : index
    %c0_7 = arith.constant 0 : index
    %8 = vector.load %arg4[%c0_6, %c0_7] : memref<32x1xf32, #tpu.memory_space<vmem>>, vector<32x1xf32>
    %9 = vector.broadcast %8 : vector<32x1xf32> to vector<32x128xf32>
    %10 = arith.mulf %7, %9 : vector<32x128xf32>
    %cst_8 = arith.constant dense<0.000000e+00> : vector<128xf32>
    %11 = vector.multi_reduction <add>, %10, %cst_8 [0] : vector<32x128xf32> to vector<128xf32>
    %12 = vector.shape_cast %11 : vector<128xf32> to vector<1x128xf32>
    %c0_9 = arith.constant 0 : index
    %c0_10 = arith.constant 0 : index
    %13 = vector.load %arg5[%c0_9, %c0_10] : memref<1x1xf32, #tpu.memory_space<vmem>>, vector<1x1xf32>
    %14 = vector.broadcast %13 : vector<1x1xf32> to vector<1x128xf32>
    %15 = arith.addf %12, %14 : vector<1x128xf32>
    %c0_11 = arith.constant 0 : index
    %c0_12 = arith.constant 0 : index
    %16 = vector.load %arg6[%c0_11, %c0_12] : memref<1x128xf32, #tpu.memory_space<vmem>>, vector<1x128xf32>
    tpu.vector_store %arg6[%c0_11, %c0_12], %15 {strides = array<i32>} : memref<1x128xf32, #tpu.memory_space<vmem>>, vector<1x128xf32>,
    return
  }
  func.func @transform_0(%arg0: i32) -> (i32, i32) {
    %c0_i32 = arith.constant 0 : i32
    %c0_i32_0 = arith.constant 0 : i32
    return %c0_i32, %arg0 : i32, i32
  }
  func.func @transform_1(%arg0: i32) -> (i32, i32) {
    %c0_i32 = arith.constant 0 : i32
    %c0_i32_0 = arith.constant 0 : i32
    %c0_i32_1 = arith.constant 0 : i32
    return %c0_i32, %c0_i32_0 : i32, i32
  }
  func.func @transform_2(%arg0: i32) -> (i32, i32) {
    %c0_i32 = arith.constant 0 : i32
    %c0_i32_0 = arith.constant 0 : i32
    %c0_i32_1 = arith.constant 0 : i32
    return %c0_i32, %c0_i32_0 : i32, i32
  }
  func.func @transform_3(%arg0: i32) -> (i32, i32) {
    %c0_i32 = arith.constant 0 : i32
    %c0_i32_0 = arith.constant 0 : i32
    %c0_i32_1 = arith.constant 0 : i32
    return %c0_i32, %c0_i32_0 : i32, i32
  }
  func.func @transform_4(%arg0: i32) -> (i32, i32) {
    %c0_i32 = arith.constant 0 : i32
    %c0_i32_0 = arith.constant 0 : i32
    %c0_i32_1 = arith.constant 0 : i32
    return %c0_i32, %c0_i32_0 : i32, i32
  }
  func.func @transform_5(%arg0: i32) -> (i32, i32) {
    %c0_i32 = arith.constant 0 : i32
    %c0_i32_0 = arith.constant 0 : i32
    return %c0_i32, %arg0 : i32, i32
  }
}

</mosaic_0001>

<bundles_post_ra>
// kernel: tpu_custom_call.1
= control target key start
LH: loop header
LB: loop body
LE: loop exit
PB: predicated region body
PF: predicated region fallthrough
CT: control target
= control target key end

     0   :  { %s686_s0 = inlined_call_operand.vmem [shape: f32[8,512], index: 0, kind: input, shape index: {}]   ;;  %s687_s1 = inlined_call_operand.vmem [shape: f32[32,8], index: 1, kind: input, shape index: {}]   ;;  %s688_s2 = inlined_call_operand.vmem [shape: f32[32,1], index: 2, kind: input, shape index: {}]   ;;  %s689_s3 = inlined_call_operand.vmem [shape: f32[32,1], index: 3, kind: input, shape index: {}]   ;;  %s690_s4 = inlined_call_operand.<no memory space> [shape: f32[1,1], index: 4, kind: input, shape index: {}]   ;;  %s691_s5 = inlined_call_operand.hbm [shape: f32[1,512], index: 5, kind: output, shape index: {}]  }
   0x1   :  { %v10_v0 = vstv %s690_s4 }
   0x2   :  { %11 = vst [vmem:[#allocation2] sm:$0x1] %v10_v0 }
   0x3   :  { %12 = vsyncpa [#allocation4], 0 }
   0x4   :  { %14 = vsyncpa [#allocation4 + $0x1], 0  ;;  %s565_s20 = smov 0   ;;  %s567_s21 = smov 0  }
   0x5   :  { %s569_s22 = smov 0   ;;  %s571_s23 = smov 0  }
   0x6 LB: > { %s586_s4 = sadd.s32 4294967295, %s529_s23   ;;  %s410_s24 = sadd.s32 4294967294, %s529_s23   ;;  %s529_s23 = sphi %s571_s23, %s697_s23   ;;  %s525_s22 = sphi %s569_s22, %s696_s22   ;;  %s521_s21 = sphi %s567_s21, %s695_s21   ;;  %s517_s20 = sphi %s565_s20, %s694_s20  }
   0x7   : > { %s590_s25 = sadd.s32 1, %s529_s23   ;;  %s137_s26 = sadd.s32 1, %s525_s22 }
   0x8   : > { %s134_s27 = ssub.s32 %s529_s23, %s590_s25  ;;  %p147_p0 = scmp.ne.s32.totalorder %s525_s22, %s521_s21 }
   0x9   : > { %p135_p1 = scmp.eq.s32.totalorder %s134_s27, 0  ;;  %p148_p2 = scmp.eq.s32.totalorder %s586_s4, 3 }
   0xa   : > { %p153_p3 = scmp.ne.s32.totalorder %s521_s21, %s517_s20  ;;  %p154_p4 = scmp.eq.s32.totalorder %s410_s24, 3 }
   0xb   : > { %s601_s28 = scalar_select %p135_p1, %s525_s22, %s137_s26  }
   0xc   : > { %p603_p5 = por %p148_p2, %p147_p0  ;;  %p607_p6 = por %p154_p4, %p153_p3 }
   0xd   : > { %p413_p7 = scmp.ge.s32.totalorder %s529_s23, 1  ;;  %p191_p8 = scmp.lt.s32.totalorder %s529_s23, 5 }
   0xf   : > { %p192_p9 = pnand %p413_p7, %p191_p8 }
  0x10   : > { %p217_p10 = scmp.lt.s32.totalorder (!%p192_p9), %s586_s4, 3  ;;  %s215_s18 = sand.u32 (!%p192_p9), 1, %s521_s21  }
  0x11   : > { %195 = sbr.rel (%p192_p9) target bundleno = 189 (0xbd), region = 40  ;;  %s351_s26 = scalar_lea.hbm (!%p192_p9), %s691_s5, %s586_s4 }
  0x12   : > { %s216_s27 = scalar_lea.vmem (!%p192_p9), [#allocation3], %s215_s18  ;;  %s355_s7 = sshll.u32 (!%p192_p9), %s351_s26, 4  ;;  %s356_s7 = int_to_ptr.hbm [resolvable:$true] %s355_s7 }
  0x13   : > { %s353_s6 = sshll.u32 (!%p192_p9), %s216_s27, 4  ;;  %s343_s8 = scalar_lea.sflag (!%p192_p9), [#allocation4], %s215_s18  ;;  %s354_s6 = int_to_ptr.vmem [resolvable:$true] %s353_s6 }
  0x14   : > { %s481_s9 = sshra.s32 (!%p192_p9), %s356_s7, 4  ;;  %s487_s12 = scalar_lea.hbm (!%p192_p9), %s691_s5, 4  ;;  %s482_s9 = int_to_ptr.hbm [resolvable:$true] %s481_s9 }
  0x15   : > { %p488_p0 = scmp.lt.s32.totalorder (!%p192_p9), %s482_s9, %s691_s5 }
  0x16   : > { %v228_v1 = vld [vmem:[%s688_s2 + $0x10] sm:$0xff]  ;;  %v226_v2 = vld [vmem:[%s688_s2] sm:$0xff]  ;;  %v531_v3 = vmov 0   ;;  %s218_s10 = scalar_select %p217_p10, %s586_s4, 3  ;;  %vm250_vm0 = vcmask 64512   ;;  %v222_v7 = vld [vmem:[%s687_s1 + $0x8] sm:$0xff] }
  0x17   : > { %465 = vset.pattern.permute.xlu1 %v531_v3  ;;  %464 = vset.pattern.permute.xlu0 %v531_v3  ;;  %v296_v4 = vld [vmem:[%s689_s3] sm:$0xff]  ;;  %v223_v8 = vld [vmem:[%s687_s1 + $0x10] sm:$0xff]  ;;  %v224_v9 = vld [vmem:[%s687_s1 + $0x18] sm:$0xff] }
  0x18   : > { %242 = vperm.xlu1 %465, %v228_v1   ;;  %232 = vperm.xlu0 %464, %v226_v2   ;;  %s414_s13 = sshll.u32 %s218_s10, 3  ;;  %v221_v6 = vld [vmem:[%s687_s1] sm:$0xff]  ;;  %v229_v10 = vld [vmem:[%s688_s2 + $0x18] sm:$0xff]  ;;  %v227_v11 = vld [vmem:[%s688_s2 + $0x8] sm:$0xff]  ;;  %s483_s10 = scalar_lea.hbm %s482_s9, 1 }
  0x19   : > { %466 = vset.pattern.permute.xlu2 %v531_v3  ;;  %s220_s16 = scalar_lea.vmem %s686_s0, %s414_s13  ;;  %v297_v12 = vld [vmem:[%s689_s3 + $0x8] sm:$0xff]  ;;  %v299_v13 = vld [vmem:[%s689_s3 + $0x18] sm:$0xff]  ;;  %v298_v14 = vld [vmem:[%s689_s3 + $0x10] sm:$0xff]  ;;  %p484_p11 = scmp.ne.s32.totalorder %s482_s9, %s483_s10 }
  0x1a   : > { %302 = vperm.xlu2 %466, %v296_v4   ;;  %v225_v5 = vld [vmem:[%s220_s16] sm:$0xff]  ;;  %p489_p1 = scmp.lt.s32.totalorder %s487_s12, %s483_s10 }
  0x1b   : > { %278 = vmatpush.msra.mxu0 %v225_v5  ;;  %421 = vmatpush.msra.mxu1 %v225_v5  ;;  %v333_v15 = vld [vmem:[#allocation2] sm:$0x1]  ;;  %p485_p12 = pnand %p484_p11, %p603_p5 }
  0x1c   : > { %422 = vmatpush.msra.mxu2 %v225_v5  ;;  %423 = vmatpush.msra.mxu3 %v225_v5  ;;  %p490_p2 = por %p489_p1, %p488_p0 }
  0x1d   : > { %415 = vmatmul.msk.f32.vlgmr.msra.gmra.mxu0 %vm250_vm0, %v221_v6  ;;  %416 = vmatmul.msk.f32.vlgmr.msra.gmra.mxu1 %vm250_vm0, %v222_v7  ;;  %p486_p13 = pneg %p485_p12 }
  0x1e   : > { %417 = vmatmul.msk.f32.vlgmr.msra.gmra.mxu2 %vm250_vm0, %v223_v8  ;;  %418 = vmatmul.msk.f32.vlgmr.msra.gmra.mxu3 %vm250_vm0, %v224_v9 }
  0x1f   : > { %p491_p3 = pnand %p490_p2, %p486_p13 }
  0x20   : > { %247 = vperm.xlu1 %465, %v229_v10   ;;  %237 = vperm.xlu0 %464, %v227_v11  }
  0x22   : > { %307 = vperm.xlu2 %466, %v297_v12  }
  0x28   : > { %317 = vperm.xlu1 %465, %v299_v13   ;;  %312 = vperm.xlu0 %464, %v298_v14  }
  0x2a   : > { %336 = vperm.xlu2 %466, %v333_v15  }
  0x74   : > { %v303_v18 = vpop.permute.xlu2 %302 }
  0x7c   : > { %v308_v27 = vpop.permute.xlu2 %307 }
  0x84   : > { %v337_v47 = vpop.permute.xlu2 %336 }
  0x85   : > { %v339_v49 = vperm.slane %v337_v47, 0 }
  0x8a   : > { %v233_v16 = vpop.permute.xlu0 %232  ;;  %v243_v17 = vpop.permute.xlu1 %242 }
  0x92   : > { %v238_v19 = vpop.permute.xlu0 %237  ;;  %v248_v24 = vpop.permute.xlu1 %247 }
  0x9a   : > { %v280_v20 = vpop.f32.mrf.mxu0  ;;  %v283_v21 = vpop.f32.mrf.mxu1 }
  0x9b   : > { %v281_v22 = vadd.f32 %v280_v20, %v233_v16  ;;  %v284_v23 = vadd.f32 %v283_v21, %v238_v19  ;;  %v313_v36 = vpop.permute.xlu0 %312  ;;  %v318_v39 = vpop.permute.xlu1 %317 }
  0x9d   : > { %v292_v25 = vmax.f32 %v281_v22, 0.0  ;;  %v293_v26 = vmax.f32 %v284_v23, 0.0 }
  0x9f   : > { %v320_v30 = vmul.f32 %v303_v18, %v292_v25  ;;  %v321_v31 = vmul.f32 %v308_v27, %v293_v26 }
  0xa1   : > { %v286_v28 = vpop.f32.mrf.mxu2  ;;  %v289_v29 = vpop.f32.mrf.mxu3  ;;  %v324_v37 = vadd.f32 %v321_v31, %v320_v30 }
  0xa2   : > { %v287_v32 = vadd.f32 %v286_v28, %v243_v17  ;;  %v290_v33 = vadd.f32 %v289_v29, %v248_v24 }
  0xa4   : > { %v294_v34 = vmax.f32 %v287_v32, 0.0  ;;  %v295_v35 = vmax.f32 %v290_v33, 0.0 }
  0xa6   : > { %v322_v38 = vmul.f32 %v313_v36, %v294_v34  ;;  %v323_v41 = vmul.f32 %v318_v39, %v295_v35 }
  0xa8   : > { %v325_v40 = vadd.f32 %v324_v37, %v322_v38 }
  0xaa   : > { %v326_v42 = vadd.f32 %v325_v40, %v323_v41 }
  0xac   : > { %v327_v43 = vrot.slane %v326_v42, 4 }
  0xae   : > { %v328_v44 = vadd.f32 %v327_v43, %v326_v42 }
  0xb0   : > { %v329_v45 = vrot.slane %v328_v44, 2 }
  0xb2   : > { %v330_v46 = vadd.f32 %v329_v45, %v328_v44 }
  0xb4   : > { %v331_v48 = vrot.slane %v330_v46, 1 }
  0xb6   : > { %v332_v50 = vadd.f32 %v331_v48, %v330_v46 }
  0xb8   : > { %v340_v51 = vadd.f32 %v339_v49, %v332_v50 }
  0xba   : > { %341 = vst [vmem:[%s216_s27] sm:$0x1] %v340_v51 }
  0xbb   : > { %494 = shalt.err (!%p491_p3)
}
  0xbc   : > { %424 = dma.vmem_to_hbm [thread:$0]  (%p603_p5), %s354_s6, 16, %s356_s7, %s343_s8  }
  0xbd PF: > { %p430_p4 = scmp.ge.s32.totalorder %s529_s23, 2  ;;  %s367_s15 = sand.u32 1, %s517_s20  }
  0xbe   : > { %s368_s16 = scalar_lea.sflag [#allocation4], %s367_s15 }
  0xbf   : > { %p427_p7 = pnand %p430_p4, %p607_p6 }
  0xc1   : > { %p428_p8 = pneg %p427_p7 }
  0xc3   : > { %512 = dma.done.wait (%p428_p8), %s368_s16, 16  }
  0xc4   : > { %514 = vsyncadd (%p428_p8), %s368_s16, 4294967280  ;;  %p17_p9 = scmp.ge.s32.totalorder %s590_s25, 6   ;;  %s694_s20 = smov %s521_s21 }
  0xc5   : > { %s695_s21 = smov %s525_s22  ;;  %s696_s22 = smov %s601_s28 }
  0xc6   : > { %s697_s23 = smov %s590_s25  ;;  %19 = sbr.rel (!%p17_p9) target bundleno = 6 (0x6), region = 75 }
  0xcb   :  { %373 = vsyncpa [#allocation4], 1 }
  0xcc   :  { %375 = vsyncpa [#allocation4 + $0x1], 1 }

</bundles_post_ra>
